<compile_context>
chip_gen: v5e
topology: v5e:2x2
jax: 0.10.0
libtpu: 0.0.40
codegen_flags: <defaults>
</compile_context>

<pallas_src>
import jax
import jax.numpy as jnp
from jax.experimental import pallas as pl
from jax.experimental.pallas import tpu as pltpu

_MIB = 1024 * 1024


# ----------------------------------------------------------------------------
# Small helpers
# ----------------------------------------------------------------------------
def _round_up(x, m):
    return ((x + m - 1) // m) * m


def _tpu_vmem_capacity_bytes():
    """Generation-aware VMEM capacity (falls back to the smallest, v7x 64 MiB)."""
    try:
        return int(pltpu.get_tpu_info().vmem_capacity_bytes)
    except Exception:
        return 64 * _MIB


_PIPELINE_MODE_OK = None


def _copy_probe_kernel(x_ref, o_ref):
    o_ref[...] = x_ref[...]


def _pipeline_mode_supported():
    """One-time probe: does this jax/Mosaic accept pipeline_mode=pl.Buffered(1)?

    Feature-detected once with a tiny kernel (compile + run) instead of
    wrapping the real kernel call in a broad try/except.
    """
    global _PIPELINE_MODE_OK
    if _PIPELINE_MODE_OK is None:
        if not hasattr(pl, "Buffered"):
            _PIPELINE_MODE_OK = False
        else:
            try:
                spec = pl.BlockSpec((8, 128), lambda i: (i, 0),
                                    pipeline_mode=pl.Buffered(1))
                out = pl.pallas_call(
                    _copy_probe_kernel,
                    out_shape=jax.ShapeDtypeStruct((8, 128), jnp.float32),
                    grid=(1,),
                    in_specs=[spec],
                    out_specs=pl.BlockSpec((8, 128), lambda i: (i, 0)),
                )(jnp.zeros((8, 128), jnp.float32))
                jax.block_until_ready(out)
                _PIPELINE_MODE_OK = True
            except Exception:
                _PIPELINE_MODE_OK = False
    return _PIPELINE_MODE_OK


def _block_spec(shape, index_map, *, single_buffer=False):
    """BlockSpec, optionally single-buffered (for grid-resident blocks)."""
    if single_buffer and _pipeline_mode_supported():
        return pl.BlockSpec(shape, index_map, pipeline_mode=pl.Buffered(1))
    return pl.BlockSpec(shape, index_map)


def _largest_divisor_multiple_of_128(n, target):
    """Largest multiple-of-128 divisor of n that is <= target (n % 128 == 0)."""
    target = max(128, (target // 128) * 128)
    for c in range(min(target, n), 127, -128):
        if n % c == 0:
            return c
    return 128


# ----------------------------------------------------------------------------
# One-time parameter preparation (OUTSIDE the hot path)
# ----------------------------------------------------------------------------
def prepare_expert_params(w1, b1, w2, b2, compute_dtype=jnp.bfloat16):
    """One-time init-side prep: cast weights to bf16, split W1/b1 into gate/up
    halves, and zero-pad d_ff to a multiple of 128 (zero-padding is exact:
    silu(0)*0 = 0, and padded W2 rows are zero).

    Layouts (pre-transposed vs. nn.Linear): w1 [dim, 2*d_ff], b1 [2*d_ff],
    w2 [d_ff, dim], b2 [dim].
    """
    dim, two_dff = w1.shape
    d_ff = two_dff // 2
    assert w2.shape == (d_ff, dim)
    d_ff_pad = _round_up(d_ff, 128)
    pad = d_ff_pad - d_ff

    w1g = w1[:, :d_ff].astype(compute_dtype)
    w1u = w1[:, d_ff:].astype(compute_dtype)
    w2c = w2.astype(compute_dtype)
    b1g = b1[:d_ff].astype(jnp.float32)
    b1u = b1[d_ff:].astype(jnp.float32)
    if pad:
        w1g = jnp.pad(w1g, ((0, 0), (0, pad)))
        w1u = jnp.pad(w1u, ((0, 0), (0, pad)))
        w2c = jnp.pad(w2c, ((0, pad), (0, 0)))
        b1g = jnp.pad(b1g, (0, pad))
        b1u = jnp.pad(b1u, (0, pad))

    return dict(
        w1g=w1g, w1u=w1u, w2=w2c,
        b1g=b1g.reshape(1, d_ff_pad), b1u=b1u.reshape(1, d_ff_pad),
        b2=b2.reshape(1, dim).astype(jnp.float32),
        dim=dim, d_ff=d_ff, d_ff_pad=d_ff_pad,
    )


# ----------------------------------------------------------------------------
# Kernels
# ----------------------------------------------------------------------------
def _expert_kernel_resident(x_ref, w1g_ref, w1u_ref, b1g_ref, b1u_ref,
                            w2_ref, b2_ref, o_ref):
    """Whole (padded) d_ff resident: no accumulator, direct output write."""
    x = x_ref[...].astype(w1g_ref.dtype)
    gate = jnp.dot(x, w1g_ref[...], preferred_element_type=jnp.float32)
    gate = gate + b1g_ref[...]
    up = jnp.dot(x, w1u_ref[...], preferred_element_type=jnp.float32)
    up = up + b1u_ref[...]
    act = gate * jax.nn.sigmoid(gate) * up              # silu_and_mul (f32/EUP)
    y = jnp.dot(act.astype(w2_ref.dtype), w2_ref[...],
                preferred_element_type=jnp.float32)
    o_ref[...] = (y + b2_ref[...]).astype(o_ref.dtype)


def _expert_kernel_chunked(x_ref, w1g_ref, w1u_ref, b1g_ref, b1u_ref,
                           w2_ref, b2_ref, o_ref, acc_ref):
    """d_ff chunked along the trailing (arbitrary) grid axis; f32 accumulator
    resident in VMEM; first chunk writes, later chunks add (no zero-init store)."""
    j = pl.program_id(1)

    x = x_ref[...].astype(w1g_ref.dtype)
    gate = jnp.dot(x, w1g_ref[...], preferred_element_type=jnp.float32)
    gate = gate + b1g_ref[...]
    up = jnp.dot(x, w1u_ref[...], preferred_element_type=jnp.float32)
    up = up + b1u_ref[...]
    act = gate * jax.nn.sigmoid(gate) * up
    partial = jnp.dot(act.astype(w2_ref.dtype), w2_ref[...],
                      preferred_element_type=jnp.float32)

    @pl.when(j == 0)
    def _first():
        acc_ref[...] = partial

    @pl.when(j != 0)
    def _accumulate():
        acc_ref[...] += partial

    @pl.when(j == pl.num_programs(1) - 1)
    def _finalize():
        o_ref[...] = (acc_ref[...] + b2_ref[...]).astype(o_ref.dtype)


# ----------------------------------------------------------------------------
# Tile selection (generation-aware)
# ----------------------------------------------------------------------------
def _estimate_vmem(tt, ff, n_ff, dim, x_itm, out_itm, w_itm):
    resident = (n_ff == 1)
    wbuf = 1 if (resident and _pipeline_mode_supported()) else 2
    total = 2 * tt * dim * x_itm                       # x tile (double-buffered)
    total += 2 * tt * dim * out_itm                    # out tile (double-buffered)
    total += wbuf * (2 * dim * ff + ff * dim) * w_itm  # W1g + W1u + W2 chunks
    total += wbuf * 2 * ff * 4 + dim * 4               # b1 gate/up chunks + b2
    if not resident:
        total += tt * dim * 4                          # f32 accumulator scratch
    return total


def _select_tiles(T, dim, d_ff_pad, x_itm, out_itm, w_itm, token_tile, ff_tile):
    capacity = _tpu_vmem_capacity_bytes()
    budget = int(capacity * 0.75)                      # headroom for Mosaic scratch
    vmem_limit = min(capacity, budget + 16 * _MIB)
    t_cap = _round_up(max(T, 1), 16)

    def fits(tt, ff, n_ff):
        return _estimate_vmem(tt, ff, n_ff, dim, x_itm, out_itm, w_itm) <= budget

    # --- resident-weights path (ff == d_ff_pad): weights DMAed exactly once ---
    if ff_tile is None or ff_tile >= d_ff_pad:
        if token_tile is not None:
            tt = min(_round_up(token_tile, 16), t_cap)
        else:
            tt = min(256, t_cap)
            while tt < min(t_cap, 1024) and fits(tt * 2, d_ff_pad, 1):
                tt *= 2
            tt = min(tt, t_cap)
        if fits(tt, d_ff_pad, 1):
            return tt, d_ff_pad, 1, vmem_limit
        # a user-forced token_tile that doesn't fit resident falls through

    # --- chunked d_ff path: large token tiles amortize weight streaming ---
    target_ff = min(ff_tile or 512, d_ff_pad)
    ff = _largest_divisor_multiple_of_128(d_ff_pad, target_ff)
    tt = min(_round_up(token_tile or 1024, 16), t_cap)
    while tt > 256 and not fits(tt, ff, 2):
        tt = max(256, _round_up(tt // 2, 16))
    while ff > 128 and not fits(tt, ff, 2):
        ff = _largest_divisor_multiple_of_128(d_ff_pad, ff - 128)
    n_ff = d_ff_pad // ff
    return tt, ff, n_ff, vmem_limit


# ----------------------------------------------------------------------------
# pallas_call builder + forward
# ----------------------------------------------------------------------------
def _build_call(T, dim, tt, ff, n_tok, n_ff, out_dtype, vmem_limit, cost):
    resident = (n_ff == 1)
    if resident:
        grid = (n_tok,)
        dims = ("parallel",)
        kernel = _expert_kernel_resident
        scratch = []
        x_spec = pl.BlockSpec((tt, dim), lambda i: (i, 0))
        w1_spec = _block_spec((dim, ff), lambda i: (0, 0), single_buffer=True)
        b1_spec = _block_spec((1, ff), lambda i: (0, 0), single_buffer=True)
        w2_spec = _block_spec((ff, dim), lambda i: (0, 0), single_buffer=True)
        b2_spec = _block_spec((1, dim), lambda i: (0, 0), single_buffer=True)
        out_spec = pl.BlockSpec((tt, dim), lambda i: (i, 0))
    else:
        grid = (n_tok, n_ff)
        dims = ("parallel", "arbitrary")
        kernel = _expert_kernel_chunked
        scratch = [pltpu.VMEM((tt, dim), jnp.float32)]
        x_spec = pl.BlockSpec((tt, dim), lambda i, j: (i, 0))
        w1_spec = pl.BlockSpec((dim, ff), lambda i, j: (0, j))
        b1_spec = pl.BlockSpec((1, ff), lambda i, j: (0, j))
        w2_spec = pl.BlockSpec((ff, dim), lambda i, j: (j, 0))
        b2_spec = _block_spec((1, dim), lambda i, j: (0, 0), single_buffer=True)
        out_spec = pl.BlockSpec((tt, dim), lambda i, j: (i, 0))

    return pl.pallas_call(
        kernel,
        out_shape=jax.ShapeDtypeStruct((T, dim), out_dtype),
        grid_spec=pltpu.PrefetchScalarGridSpec(
            num_scalar_prefetch=0,
            grid=grid,
            in_specs=[x_spec, w1_spec, w1_spec, b1_spec, b1_spec, w2_spec,
                      b2_spec],
            out_specs=out_spec,
            scratch_shapes=scratch,
        ),
        compiler_params=pltpu.CompilerParams(
            dimension_semantics=dims,
            vmem_limit_bytes=vmem_limit,
        ),
        cost_estimate=cost,
    )


def expert_forward(x, params, *, token_tile=None, ff_tile=None):
    """Fused Expert forward. x: [..., dim]; params from prepare_expert_params()."""
    dim = params["dim"]
    d_ff_pad = params["d_ff_pad"]
    orig_shape = x.shape
    out_dtype = x.dtype
    xt = x.reshape(-1, dim)                 # original dtype; cast to bf16 in-kernel
    T = xt.shape[0]

    x_itm = jnp.dtype(xt.dtype).itemsize
    out_itm = jnp.dtype(out_dtype).itemsize
    w_itm = jnp.dtype(params["w1g"].dtype).itemsize

    tt, ff, n_ff, vmem_limit = _select_tiles(
        T, dim, d_ff_pad, x_itm, out_itm, w_itm, token_tile, ff_tile)
    n_tok = pl.cdiv(T, tt)

    weight_elems = params["w1g"].size + params["w1u"].size + params["w2"].size
    weight_reads = 1 if n_ff == 1 else n_tok   # chunked regime re-streams weights
    cost = pl.CostEstimate(
        flops=int(6 * T * dim * d_ff_pad),
        transcendentals=int(T * d_ff_pad),
        bytes_accessed=int(T * dim * (x_itm + out_itm)
                           + weight_reads * weight_elems * w_itm
                           + (2 * d_ff_pad + dim) * 4),
    )

    call = _build_call(T, dim, tt, ff, n_tok, n_ff, out_dtype, vmem_limit, cost)
    out = call(xt, params["w1g"], params["w1u"], params["b1g"], params["b1u"],
               params["w2"], params["b2"])
    return out.reshape(orig_shape[:-1] + (dim,))


# ----------------------------------------------------------------------------
# Pure-JAX reference (matching bf16-operand / f32-accumulate precision)
# ----------------------------------------------------------------------------
def _ref_forward(x, w1, b1, w2, b2, compute_dtype=jnp.bfloat16):
    f32 = jnp.float32
    xc = x.astype(compute_dtype).astype(f32)
    w1c = w1.astype(compute_dtype).astype(f32)
    w2c = w2.astype(compute_dtype).astype(f32)
    h = jnp.einsum("...d,df->...f", xc, w1c) + b1.astype(f32)
    d = h.shape[-1] // 2
    gate, up = h[..., :d], h[..., d:]
    act = gate * jax.nn.sigmoid(gate) * up
    act = act.astype(compute_dtype).astype(f32)
    y = jnp.einsum("...f,fd->...d", act, w2c) + b2.astype(f32)
    return y.astype(x.dtype)


if __name__ == "__main__":
    # Module config (ExpertArgs defaults): dim=128, d_ff=256.
    dim, d_ff = 128, 256
    batch, seq = 2, 8

    key = jax.random.PRNGKey(0)
    kx, k1, kb1, k2, kb2 = jax.random.split(key, 5)

    # Parameters stored pre-transposed vs. nn.Linear: W1 [dim, 2*d_ff],
    # W2 [d_ff, dim]; uniform(-1/sqrt(fan_in), 1/sqrt(fan_in)) init.
    bound1 = 1.0 / jnp.sqrt(dim)
    w1 = jax.random.uniform(k1, (dim, 2 * d_ff), jnp.float32, -bound1, bound1)
    b1 = jax.random.uniform(kb1, (2 * d_ff,), jnp.float32, -bound1, bound1)
    bound2 = 1.0 / jnp.sqrt(d_ff)
    w2 = jax.random.uniform(k2, (d_ff, dim), jnp.float32, -bound2, bound2)
    b2 = jax.random.uniform(kb2, (dim,), jnp.float32, -bound2, bound2)

    # One-time init-side weight preparation (outside the hot path).
    params = prepare_expert_params(w1, b1, w2, b2)

    x = jax.random.normal(kx, (batch, seq, dim), jnp.float32)

    # Default path: weights fully resident, single grid step over 16 tokens.
    y = jax.block_until_ready(expert_forward(x, params))
    y_ref = _ref_forward(x, w1, b1, w2, b2)
    assert y.shape == (batch, seq, dim)
    assert jnp.allclose(y, y_ref, atol=1e-2, rtol=1e-2), \
        float(jnp.max(jnp.abs(y - y_ref)))

    # Exercise the chunked-d_ff accumulator path and a ragged (masked) token
    # tail: T = 26 tokens, tt = 16, d_ff split into 2 chunks of 128.
    x2 = jax.random.normal(kx, (batch, 13, dim), jnp.float32)
    y2 = jax.block_until_ready(
        expert_forward(x2, params, token_tile=16, ff_tile=128))
    y2_ref = _ref_forward(x2, w1, b1, w2, b2)
    assert y2.shape == (batch, 13, dim)
    assert jnp.allclose(y2, y2_ref, atol=1e-2, rtol=1e-2), \
        float(jnp.max(jnp.abs(y2 - y2_ref)))

    print("KERNEL_OK")
</pallas_src>

<mosaic_0001>
module attributes {stable_mosaic.version = 11 : i64} {
  func.func @_copy_probe_kernel(%arg0: i32, %arg1: memref<8x128xf32, #tpu.memory_space<vmem>>, %arg2: memref<8x128xf32, #tpu.memory_space<vmem>>) attributes {dimension_semantics = [#tpu.dimension_semantics<arbitrary>], iteration_bounds = array<i64: 1>, scalar_prefetch = 0 : i64, scratch_operands = 0 : i64, tpu.core_type = #tpu.core_type<tc>, window_params = [{pipeline_mode = #tpu.pipeline_mode<synchronous>, transform_indices = @transform_0, window_bounds = array<i64: 8, 128>}, {transform_indices = @transform_1, window_bounds = array<i64: 8, 128>}]} {
    %c0 = arith.constant 0 : index
    %c0_0 = arith.constant 0 : index
    %0 = vector.load %arg1[%c0, %c0_0] : memref<8x128xf32, #tpu.memory_space<vmem>>, vector<8x128xf32>
    %c0_1 = arith.constant 0 : index
    %c0_2 = arith.constant 0 : index
    %1 = vector.load %arg2[%c0_1, %c0_2] : memref<8x128xf32, #tpu.memory_space<vmem>>, vector<8x128xf32>
    tpu.vector_store %arg2[%c0_1, %c0_2], %0 {strides = array<i32>} : memref<8x128xf32, #tpu.memory_space<vmem>>, vector<8x128xf32>,
    return
  }
  func.func @transform_0(%arg0: i32) -> (i32, i32) {
    %c0_i32 = arith.constant 0 : i32
    %c0_i32_0 = arith.constant 0 : i32
    return %arg0, %c0_i32 : i32, i32
  }
  func.func @transform_1(%arg0: i32) -> (i32, i32) {
    %c0_i32 = arith.constant 0 : i32
    %c0_i32_0 = arith.constant 0 : i32
    return %arg0, %c0_i32 : i32, i32
  }
}

module attributes {stable_mosaic.version = 11 : i64} {
  func.func @_expert_kernel_resident(%arg0: i32, %arg1: memref<16x128xf32, #tpu.memory_space<vmem>>, %arg2: memref<128x256xbf16, #tpu.memory_space<vmem>>, %arg3: memref<128x256xbf16, #tpu.memory_space<vmem>>, %arg4: memref<1x256xf32, #tpu.memory_space<vmem>>, %arg5: memref<1x256xf32, #tpu.memory_space<vmem>>, %arg6: memref<256x128xbf16, #tpu.memory_space<vmem>>, %arg7: memref<1x128xf32, #tpu.memory_space<vmem>>, %arg8: memref<16x128xf32, #tpu.memory_space<vmem>>) attributes {dimension_semantics = [#tpu.dimension_semantics<parallel>], iteration_bounds = array<i64: 1>, scalar_prefetch = 0 : i64, scratch_operands = 0 : i64, tpu.core_type = #tpu.core_type<tc>, window_params = [{transform_indices = @transform_0, window_bounds = array<i64: 16, 128>}, {pipeline_mode = #tpu.pipeline_mode<synchronous>, transform_indices = @transform_1, window_bounds = array<i64: 128, 256>}, {pipeline_mode = #tpu.pipeline_mode<synchronous>, transform_indices = @transform_2, window_bounds = array<i64: 128, 256>}, {pipeline_mode = #tpu.pipeline_mode<synchronous>, transform_indices = @transform_3, window_bounds = array<i64: 1, 256>}, {pipeline_mode = #tpu.pipeline_mode<synchronous>, transform_indices = @transform_4, window_bounds = array<i64: 1, 256>}, {pipeline_mode = #tpu.pipeline_mode<synchronous>, transform_indices = @transform_5, window_bounds = array<i64: 256, 128>}, {pipeline_mode = #tpu.pipeline_mode<synchronous>, transform_indices = @transform_6, window_bounds = array<i64: 1, 128>}, {transform_indices = @transform_7, window_bounds = array<i64: 16, 128>}]} {
    %c0 = arith.constant 0 : index
    %c0_0 = arith.constant 0 : index
    %0 = vector.load %arg1[%c0, %c0_0] : memref<16x128xf32, #tpu.memory_space<vmem>>, vector<16x128xf32>
    %1 = arith.truncf %0 : vector<16x128xf32> to vector<16x128xbf16>
    %c0_1 = arith.constant 0 : index
    %c0_2 = arith.constant 0 : index
    %2 = vector.load %arg2[%c0_1, %c0_2] : memref<128x256xbf16, #tpu.memory_space<vmem>>, vector<128x256xbf16>
    %cst = arith.constant dense<0.000000e+00> : vector<16x256xf32>
    %3 = tpu.matmul %1, %2, %cst {dimension_numbers = #tpu.dot_dimension_numbers<[1], [0], [0], [1], [0, 0, 1, 1], [], []>} : vector<16x128xbf16>, vector<128x256xbf16>, vector<16x256xf32> -> vector<16x256xf32>
    %c0_3 = arith.constant 0 : index
    %c0_4 = arith.constant 0 : index
    %4 = vector.load %arg4[%c0_3, %c0_4] : memref<1x256xf32, #tpu.memory_space<vmem>>, vector<1x256xf32>
    %5 = vector.broadcast %4 : vector<1x256xf32> to vector<16x256xf32>
    %6 = arith.addf %3, %5 : vector<16x256xf32>
    %c0_5 = arith.constant 0 : index
    %c0_6 = arith.constant 0 : index
    %7 = vector.load %arg3[%c0_5, %c0_6] : memref<128x256xbf16, #tpu.memory_space<vmem>>, vector<128x256xbf16>
    %cst_7 = arith.constant dense<0.000000e+00> : vector<16x256xf32>
    %8 = tpu.matmul %1, %7, %cst_7 {dimension_numbers = #tpu.dot_dimension_numbers<[1], [0], [0], [1], [0, 0, 1, 1], [], []>} : vector<16x128xbf16>, vector<128x256xbf16>, vector<16x256xf32> -> vector<16x256xf32>
    %c0_8 = arith.constant 0 : index
    %c0_9 = arith.constant 0 : index
    %9 = vector.load %arg5[%c0_8, %c0_9] : memref<1x256xf32, #tpu.memory_space<vmem>>, vector<1x256xf32>
    %10 = vector.broadcast %9 : vector<1x256xf32> to vector<16x256xf32>
    %11 = arith.addf %8, %10 : vector<16x256xf32>
    %12 = arith.negf %6 : vector<16x256xf32>
    %13 = math.exp %12 : vector<16x256xf32>
    %cst_10 = arith.constant 1.000000e+00 : f32
    %14 = vector.broadcast %cst_10 : f32 to vector<16x256xf32>
    %15 = arith.addf %14, %13 : vector<16x256xf32>
    %16 = arith.divf %14, %15 : vector<16x256xf32>
    %17 = arith.mulf %6, %16 : vector<16x256xf32>
    %18 = arith.mulf %17, %11 : vector<16x256xf32>
    %19 = arith.truncf %18 : vector<16x256xf32> to vector<16x256xbf16>
    %c0_11 = arith.constant 0 : index
    %c0_12 = arith.constant 0 : index
    %20 = vector.load %arg6[%c0_11, %c0_12] : memref<256x128xbf16, #tpu.memory_space<vmem>>, vector<256x128xbf16>
    %cst_13 = arith.constant dense<0.000000e+00> : vector<16x128xf32>
    %21 = tpu.matmul %19, %20, %cst_13 {dimension_numbers = #tpu.dot_dimension_numbers<[1], [0], [0], [1], [0, 0, 1, 1], [], []>} : vector<16x256xbf16>, vector<256x128xbf16>, vector<16x128xf32> -> vector<16x128xf32>
    %c0_14 = arith.constant 0 : index
    %c0_15 = arith.constant 0 : index
    %22 = vector.load %arg7[%c0_14, %c0_15] : memref<1x128xf32, #tpu.memory_space<vmem>>, vector<1x128xf32>
    %23 = vector.broadcast %22 : vector<1x128xf32> to vector<16x128xf32>
    %24 = arith.addf %21, %23 : vector<16x128xf32>
    %c0_16 = arith.constant 0 : index
    %c0_17 = arith.constant 0 : index
    %25 = vector.load %arg8[%c0_16, %c0_17] : memref<16x128xf32, #tpu.memory_space<vmem>>, vector<16x128xf32>
    tpu.vector_store %arg8[%c0_16, %c0_17], %24 {strides = array<i32>} : memref<16x128xf32, #tpu.memory_space<vmem>>, vector<16x128xf32>,
    return
  }
  func.func @transform_0(%arg0: i32) -> (i32, i32) {
    %c0_i32 = arith.constant 0 : i32
    %c0_i32_0 = arith.constant 0 : i32
    return %arg0, %c0_i32 : i32, i32
  }
  func.func @transform_1(%arg0: i32) -> (i32, i32) {
    %c0_i32 = arith.constant 0 : i32
    %c0_i32_0 = arith.constant 0 : i32
    %c0_i32_1 = arith.constant 0 : i32
    return %c0_i32, %c0_i32_0 : i32, i32
  }
  func.func @transform_2(%arg0: i32) -> (i32, i32) {
    %c0_i32 = arith.constant 0 : i32
    %c0_i32_0 = arith.constant 0 : i32
    %c0_i32_1 = arith.constant 0 : i32
    return %c0_i32, %c0_i32_0 : i32, i32
  }
  func.func @transform_3(%arg0: i32) -> (i32, i32) {
    %c0_i32 = arith.constant 0 : i32
    %c0_i32_0 = arith.constant 0 : i32
    %c0_i32_1 = arith.constant 0 : i32
    return %c0_i32, %c0_i32_0 : i32, i32
  }
  func.func @transform_4(%arg0: i32) -> (i32, i32) {
    %c0_i32 = arith.constant 0 : i32
    %c0_i32_0 = arith.constant 0 : i32
    %c0_i32_1 = arith.constant 0 : i32
    return %c0_i32, %c0_i32_0 : i32, i32
  }
  func.func @transform_5(%arg0: i32) -> (i32, i32) {
    %c0_i32 = arith.constant 0 : i32
    %c0_i32_0 = arith.constant 0 : i32
    %c0_i32_1 = arith.constant 0 : i32
    return %c0_i32, %c0_i32_0 : i32, i32
  }
  func.func @transform_6(%arg0: i32) -> (i32, i32) {
    %c0_i32 = arith.constant 0 : i32
    %c0_i32_0 = arith.constant 0 : i32
    %c0_i32_1 = arith.constant 0 : i32
    return %c0_i32, %c0_i32_0 : i32, i32
  }
  func.func @transform_7(%arg0: i32) -> (i32, i32) {
    %c0_i32 = arith.constant 0 : i32
    %c0_i32_0 = arith.constant 0 : i32
    return %arg0, %c0_i32 : i32, i32
  }
}

</mosaic_0001>

<bundles_post_ra>
// kernel: tpu_custom_call.1
= control target key start
LH: loop header
LB: loop body
LE: loop exit
PB: predicated region body
PF: predicated region fallthrough
CT: control target
= control target key end

     0   :  { %6 = vsyncpa [#allocation3], 0  ;;  %s114_s0 = inlined_call_operand.hbm [shape: f32[8,128], index: 0, kind: input, shape index: {}]   ;;  %s115_s1 = inlined_call_operand.hbm [shape: f32[8,128], index: 1, kind: output, shape index: {}]  }
   0x1   :  { %7 = vsyncpa [#allocation4], 0  ;;  %s13_s8 = sshll.u32 %s114_s0, 4  ;;  %s96_s9 = smov [#allocation2]   ;;  %s14_s8 = int_to_ptr.hbm [resolvable:$true] %s13_s8 }
   0x2   :  { %s15_s10 = sshll.u32 %s96_s9, 4  ;;  %s16_s10 = int_to_ptr.vmem [resolvable:$true] %s15_s10 }
   0x3   :  { %18 = dma.hbm_to_vmem [thread:$0]  %s14_s8, 128, %s16_s10, [#allocation3]  }
   0x4   :  { %92 = dma.done.wait [#allocation3], 128  }
   0x5   :  { %93 = vsyncadd [#allocation3], 4294967168  ;;  %s97_s11 = smov [#allocation5]   ;;  %s32_s15 = sshll.u32 %s115_s1, 4  ;;  %v23_v0 = vld [vmem:[#allocation2] sm:$0xff]  ;;  %s33_s15 = int_to_ptr.hbm [resolvable:$true] %s32_s15 }
   0x6   :  { %s30_s12 = sshll.u32 %s97_s11, 4  ;;  %24 = vst [vmem:[#allocation5] sm:$0xff] %v23_v0  ;;  %s31_s12 = int_to_ptr.vmem [resolvable:$true] %s30_s12 }
   0x7   :  { %35 = dma.vmem_to_hbm [thread:$0]  %s31_s12, 128, %s33_s15, [#allocation4]  }
   0x8   :  { %94 = dma.done.wait [#allocation4], 128  }
   0x9   :  { %95 = vsyncadd [#allocation4], 4294967168 }
   0xa   :  { %40 = vsyncpa [#allocation3], 1 }
   0xb   :  { %41 = vsyncpa [#allocation4], 1 }

// kernel: tpu_custom_call.1
= control target key start
LH: loop header
LB: loop body
LE: loop exit
PB: predicated region body
PF: predicated region fallthrough
CT: control target
= control target key end

     0   :  { %12 = vsyncpa [#allocation3], 0  ;;  %s1183_s0 = inlined_call_operand.hbm [shape: f32[16,128], index: 0, kind: input, shape index: {}]   ;;  %s1184_s1 = inlined_call_operand.hbm [shape: bf16[128,256], index: 1, kind: input, shape index: {}]   ;;  %s1185_s2 = inlined_call_operand.hbm [shape: bf16[128,256], index: 2, kind: input, shape index: {}]   ;;  %s1186_s3 = inlined_call_operand.vmem [shape: f32[1,256], index: 3, kind: input, shape index: {}]   ;;  %s1187_s4 = inlined_call_operand.hbm [shape: f32[1,256], index: 4, kind: input, shape index: {}]   ;;  %s1188_s5 = inlined_call_operand.hbm [shape: bf16[256,128], index: 5, kind: input, shape index: {}]   ;;  %s1189_s6 = inlined_call_operand.vmem [shape: f32[1,128], index: 6, kind: input, shape index: {}]   ;;  %s1190_s7 = inlined_call_operand.hbm [shape: f32[16,128], index: 7, kind: output, shape index: {}]  }
   0x1   :  { %13 = vsyncpa [#allocation6], 0 }
   0x2   :  { %14 = vsyncpa [#allocation9], 0 }
   0x3   :  { %15 = vsyncpa [#allocation4], 0  ;;  %s33_s26 = sshll.u32 %s1184_s1, 4  ;;  %s1058_s27 = smov [#allocation5]   ;;  %s34_s26 = int_to_ptr.hbm [resolvable:$true] %s33_s26 }
   0x4   :  { %s35_s28 = sshll.u32 %s1058_s27, 4  ;;  %s62_s8 = sshll.u32 %s1187_s4, 4  ;;  %s36_s28 = int_to_ptr.vmem [resolvable:$true] %s35_s28  ;;  %s63_s8 = int_to_ptr.hbm [resolvable:$true] %s62_s8 }
   0x5   :  { %s1059_s9 = smov 128   ;;  %s1060_s10 = smov 8  }
   0x6   :  { %41 = dma.hbm_to_vmem [thread:$0]  %s34_s26, 2048, %s36_s28, [#allocation6], %s1059_s9, %s1059_s9, %s1060_s10  }
   0x7   :  { %s1061_s11 = smov [#allocation8]   ;;  %s20_s1 = sshll.u32 %s1183_s0, 4  ;;  %s21_s1 = int_to_ptr.hbm [resolvable:$true] %s20_s1 }
   0x8   :  { %s64_s12 = sshll.u32 %s1061_s11, 4  ;;  %s46_s4 = sshll.u32 %s1185_s2, 4  ;;  %s65_s12 = int_to_ptr.vmem [resolvable:$true] %s64_s12  ;;  %s47_s4 = int_to_ptr.hbm [resolvable:$true] %s46_s4 }
   0x9   :  { %67 = dma.hbm_to_vmem [thread:$0]  %s63_s8, 32, %s65_s12, [#allocation9]  }
   0xa   :  { %s1062_s17 = smov [#allocation2]   ;;  %s1063_s19 = smov [#allocation7]  }
   0xb   :  { %s22_s18 = sshll.u32 %s1062_s17, 4  ;;  %s48_s20 = sshll.u32 %s1063_s19, 4  ;;  %s23_s18 = int_to_ptr.vmem [resolvable:$true] %s22_s18  ;;  %s49_s20 = int_to_ptr.vmem [resolvable:$true] %s48_s20 }
   0xc   :  { %28 = dma.hbm_to_vmem [thread:$0]  %s21_s1, 256, %s23_s18, [#allocation3], %s1059_s9, %s1059_s9, %s1060_s10  }
   0xd   :  { %s72_s0 = sshll.u32 %s1188_s5, 4  ;;  %s1064_s2 = smov [#allocation10]   ;;  %s73_s0 = int_to_ptr.hbm [resolvable:$true] %s72_s0 }
   0xe   :  { %54 = dma.hbm_to_vmem [thread:$0]  %s47_s4, 2048, %s49_s20, [#allocation6], %s1059_s9, %s1059_s9, %s1060_s10  }
   0xf   :  { %s74_s23 = sshll.u32 %s1064_s2, 4  ;;  %s1065_s24 = smov 64   ;;  %s75_s23 = int_to_ptr.vmem [resolvable:$true] %s74_s23 }
  0x10   :  { %s1066_s25 = smov 4  }
  0x11   :  { %80 = dma.hbm_to_vmem [thread:$0]  %s73_s0, 2048, %s75_s23, [#allocation9], %s1065_s24, %s1065_s24, %s1066_s25  }
  0x12   :  { %1050 = dma.done.wait [#allocation3], 256  }
  0x13   :  { %1051 = vsyncadd [#allocation3], 4294967040 }
  0x14   :  { %1052 = dma.done.wait [#allocation6], 4096  }
  0x15   :  { %1053 = vsyncadd [#allocation6], 4294963200 }
  0x16   :  { %1054 = dma.done.wait [#allocation9], 2080  }
  0x17   :  { %1055 = vsyncadd [#allocation9], 4294965216  ;;  %v693_v0 = vld [vmem:[#allocation5 + $0x70] sm:$0xf]  ;;  %v846_v1 = vld [vmem:[#allocation5 + $0x74] sm:$0xf0] }
  0x18   :  { %v845_v2 = vld [vmem:[#allocation5 + $0x74] sm:$0xf]  ;;  %v694_v3 = vor.u32 %v846_v1, %v693_v0  ;;  %v695_v4 = vld [vmem:[#allocation5 + $0x78] sm:$0xf0]  ;;  %v685_v5 = vld [vmem:[#allocation5 + $0x60] sm:$0xf] }
  0x19   :  { %v844_v6 = vld [vmem:[#allocation5 + $0x64] sm:$0xf0]  ;;  %v698_v7 = vor.u32 %v845_v2, %v695_v4  ;;  %v843_v8 = vld [vmem:[#allocation5 + $0x64] sm:$0xf]  ;;  %v687_v9 = vld [vmem:[#allocation5 + $0x68] sm:$0xf0] }
  0x1a   :  { %208 = vmatpush.bf16.msra.mxu0 %v694_v3  ;;  %v686_v10 = vor.u32 %v844_v6, %v685_v5  ;;  %v690_v11 = vor.u32 %v843_v8, %v687_v9  ;;  %v677_v12 = vld [vmem:[#allocation5 + $0x50] sm:$0xf]  ;;  %v842_v13 = vld [vmem:[#allocation5 + $0x54] sm:$0xf0]  ;;  %v841_v14 = vld [vmem:[#allocation5 + $0x54] sm:$0xf] }
  0x1b   :  { %222 = vmatpush.bf16.msra.mxu1 %v698_v7  ;;  %v679_v15 = vld [vmem:[#allocation5 + $0x58] sm:$0xf0]  ;;  %v757_v16 = vld [vmem:[#allocation7 + $0x70] sm:$0xf]  ;;  %v678_v17 = vor.u32 %v842_v13, %v677_v12  ;;  %v862_v18 = vld [vmem:[#allocation7 + $0x74] sm:$0xf0] }
  0x1c   :  { %v861_v19 = vld [vmem:[#allocation7 + $0x74] sm:$0xf]  ;;  %v759_v20 = vld [vmem:[#allocation7 + $0x78] sm:$0xf0]  ;;  %v682_v21 = vor.u32 %v841_v14, %v679_v15  ;;  %v669_v22 = vld [vmem:[#allocation5 + $0x40] sm:$0xf]  ;;  %v758_v25 = vor.u32 %v862_v18, %v757_v16 }
  0x1d   :  { %v840_v23 = vld [vmem:[#allocation5 + $0x44] sm:$0xf0]  ;;  %v839_v24 = vld [vmem:[#allocation5 + $0x44] sm:$0xf]  ;;  %v762_v26 = vor.u32 %v861_v19, %v759_v20  ;;  %v671_v27 = vld [vmem:[#allocation5 + $0x48] sm:$0xf0] }
  0x1e   :  { %209 = vmatpush.bf16.msra.mxu0 %v686_v10  ;;  %v749_v28 = vld [vmem:[#allocation7 + $0x60] sm:$0xf]  ;;  %v860_v29 = vld [vmem:[#allocation7 + $0x64] sm:$0xf0]  ;;  %338 = vmatpush.bf16.msra.mxu2 %v758_v25  ;;  %v859_v31 = vld [vmem:[#allocation7 + $0x64] sm:$0xf]  ;;  %v670_v33 = vor.u32 %v840_v23, %v669_v22  ;;  %v674_v37 = vor.u32 %v839_v24, %v671_v27 }
  0x1f   :  { %223 = vmatpush.bf16.msra.mxu1 %v690_v11  ;;  %352 = vmatpush.bf16.msra.mxu3 %v762_v26  ;;  %v750_v30 = vor.u32 %v860_v29, %v749_v28  ;;  %v751_v32 = vld [vmem:[#allocation7 + $0x68] sm:$0xf0]  ;;  %v661_v34 = vld [vmem:[#allocation5 + $0x30] sm:$0xf]  ;;  %v838_v35 = vld [vmem:[#allocation5 + $0x34] sm:$0xf0] }
  0x20   :  { %v754_v36 = vor.u32 %v859_v31, %v751_v32  ;;  %v741_v38 = vld [vmem:[#allocation7 + $0x50] sm:$0xf]  ;;  %v858_v39 = vld [vmem:[#allocation7 + $0x54] sm:$0xf0]  ;;  %v857_v40 = vld [vmem:[#allocation7 + $0x54] sm:$0xf]  ;;  %v662_v47 = vor.u32 %v838_v35, %v661_v34 }
  0x21   :  { %v837_v41 = vld [vmem:[#allocation5 + $0x34] sm:$0xf]  ;;  %v663_v42 = vld [vmem:[#allocation5 + $0x38] sm:$0xf0]  ;;  %v742_v44 = vor.u32 %v858_v39, %v741_v38  ;;  %v733_v46 = vld [vmem:[#allocation7 + $0x40] sm:$0xf] }
  0x22   :  { %210 = vmatpush.bf16.msra.mxu0 %v678_v17  ;;  %v743_v43 = vld [vmem:[#allocation7 + $0x58] sm:$0xf0]  ;;  %339 = vmatpush.bf16.msra.mxu2 %v750_v30  ;;  %v856_v48 = vld [vmem:[#allocation7 + $0x44] sm:$0xf0]  ;;  %v855_v49 = vld [vmem:[#allocation7 + $0x44] sm:$0xf]  ;;  %v666_v51 = vor.u32 %v837_v41, %v663_v42 }
  0x23   :  { %224 = vmatpush.bf16.msra.mxu1 %v682_v21  ;;  %353 = vmatpush.bf16.msra.mxu3 %v754_v36  ;;  %v746_v45 = vor.u32 %v857_v40, %v743_v43  ;;  %v735_v50 = vld [vmem:[#allocation7 + $0x48] sm:$0xf0]  ;;  %v653_v52 = vld [vmem:[#allocation5 + $0x20] sm:$0xf]  ;;  %v836_v53 = vld [vmem:[#allocation5 + $0x24] sm:$0xf0]  ;;  %v734_v56 = vor.u32 %v856_v48, %v733_v46 }
  0x24   :  { %v835_v54 = vld [vmem:[#allocation5 + $0x24] sm:$0xf]  ;;  %v655_v55 = vld [vmem:[#allocation5 + $0x28] sm:$0xf0]  ;;  %v738_v57 = vor.u32 %v855_v49, %v735_v50  ;;  %v725_v58 = vld [vmem:[#allocation7 + $0x30] sm:$0xf]  ;;  %v654_v59 = vor.u32 %v836_v53, %v653_v52 }
  0x25   :  { %v854_v60 = vld [vmem:[#allocation7 + $0x34] sm:$0xf0]  ;;  %v853_v61 = vld [vmem:[#allocation7 + $0x34] sm:$0xf]  ;;  %v727_v62 = vld [vmem:[#allocation7 + $0x38] sm:$0xf0]  ;;  %v658_v63 = vor.u32 %v835_v54, %v655_v55 }
  0x26   :  { %211 = vmatpush.bf16.msra.mxu0 %v670_v33  ;;  %340 = vmatpush.bf16.msra.mxu2 %v742_v44  ;;  %v645_v0 = vld [vmem:[#allocation5 + $0x10] sm:$0xf]  ;;  %v834_v1 = vld [vmem:[#allocation5 + $0x14] sm:$0xf0]  ;;  %v833_v2 = vld [vmem:[#allocation5 + $0x14] sm:$0xf]  ;;  %v726_v4 = vor.u32 %v854_v60, %v725_v58  ;;  %v730_v5 = vor.u32 %v853_v61, %v727_v62 }
  0x27   :  { %225 = vmatpush.bf16.msra.mxu1 %v674_v37  ;;  %354 = vmatpush.bf16.msra.mxu3 %v746_v45  ;;  %v647_v3 = vld [vmem:[#allocation5 + $0x18] sm:$0xf0]  ;;  %v717_v6 = vld [vmem:[#allocation7 + $0x20] sm:$0xf]  ;;  %v646_v7 = vor.u32 %v834_v1, %v645_v0  ;;  %v852_v8 = vld [vmem:[#allocation7 + $0x24] sm:$0xf0] }
  0x28   :  { %v851_v9 = vld [vmem:[#allocation7 + $0x24] sm:$0xf]  ;;  %v719_v10 = vld [vmem:[#allocation7 + $0x28] sm:$0xf0]  ;;  %v650_v11 = vor.u32 %v833_v2, %v647_v3  ;;  %v637_v12 = vld [vmem:[#allocation5] sm:$0xf]  ;;  %v718_v17 = vor.u32 %v852_v8, %v717_v6 }
  0x29   :  { %v832_v13 = vld [vmem:[#allocation5 + $0x4] sm:$0xf0]  ;;  %v831_v14 = vld [vmem:[#allocation5 + $0x4] sm:$0xf]  ;;  %v639_v15 = vld [vmem:[#allocation5 + $0x8] sm:$0xf0]  ;;  %v722_v18 = vor.u32 %v851_v9, %v719_v10 }
  0x2a   :  { %212 = vmatpush.bf16.msra.mxu0 %v662_v47  ;;  %341 = vmatpush.bf16.msra.mxu2 %v734_v56  ;;  %v103_v16 = vld [vmem:[#allocation2] sm:$0xff]  ;;  %v638_v19 = vor.u32 %v832_v13, %v637_v12  ;;  %v104_v20 = vld [vmem:[#allocation2 + $0x8] sm:$0xff]  ;;  %v642_v23 = vor.u32 %v831_v14, %v639_v15  ;;  %v701_v29 = vld [vmem:[#allocation7] sm:$0xf]  ;;  %s1067_s28 = smov [#allocation11]   ;;  %s620_s11 = sshll.u32 %s1190_s7, 4  ;;  %s621_s11 = int_to_ptr.hbm [resolvable:$true] %s620_s11 }
  0x2b   :  { %226 = vmatpush.bf16.msra.mxu1 %v666_v51  ;;  %355 = vmatpush.bf16.msra.mxu3 %v738_v57  ;;  %v709_v21 = vld [vmem:[#allocation7 + $0x10] sm:$0xf]  ;;  %v850_v22 = vld [vmem:[#allocation7 + $0x14] sm:$0xf0]  ;;  %v849_v24 = vld [vmem:[#allocation7 + $0x14] sm:$0xf]  ;;  %v105_v26 = vpack.c.bf16 %v104_v20, %v103_v16 }
  0x2c   :  { %v711_v25 = vld [vmem:[#allocation7 + $0x18] sm:$0xf0]  ;;  %v710_v27 = vor.u32 %v850_v22, %v709_v21  ;;  %v848_v30 = vld [vmem:[#allocation7 + $0x4] sm:$0xf0]  ;;  %v847_v31 = vld [vmem:[#allocation7 + $0x4] sm:$0xf] }
  0x2d   :  { %v714_v28 = vor.u32 %v849_v24, %v711_v25  ;;  %v703_v32 = vld [vmem:[#allocation7 + $0x8] sm:$0xf0]  ;;  %v702_v33 = vor.u32 %v848_v30, %v701_v29  ;;  %v870_v35 = vld [vmem:[#allocation10 + $0x38] sm:$0xff]  ;;  %v869_v37 = vld [vmem:[#allocation10 + $0x30] sm:$0xff]  ;;  %s618_s29 = sshll.u32 %s1067_s28, 4  ;;  %s619_s29 = int_to_ptr.vmem [resolvable:$true] %s618_s29 }
  0x2e   :  { %213 = vmatpush.bf16.msra.mxu0 %v654_v59  ;;  %342 = vmatpush.bf16.msra.mxu2 %v726_v4  ;;  %v706_v34 = vor.u32 %v847_v31, %v703_v32  ;;  %v878_v36 = vld [vmem:[#allocation10 + $0x78] sm:$0xff]  ;;  %v877_v38 = vld [vmem:[#allocation10 + $0x70] sm:$0xff]  ;;  %v868_v39 = vld [vmem:[#allocation10 + $0x28] sm:$0xff] }
  0x2f   :  { %227 = vmatpush.bf16.msra.mxu1 %v658_v63  ;;  %356 = vmatpush.bf16.msra.mxu3 %v730_v5  ;;  %v876_v40 = vld [vmem:[#allocation10 + $0x68] sm:$0xff]  ;;  %v867_v42 = vld [vmem:[#allocation10 + $0x20] sm:$0xff]  ;;  %v866_v47 = vld [vmem:[#allocation10 + $0x18] sm:$0xff] }
  0x30   :  { %v122_v41 = vld [vmem:[%s1186_s3] sm:$0x3]  ;;  %v875_v43 = vld [vmem:[#allocation10 + $0x60] sm:$0xff]  ;;  %v874_v48 = vld [vmem:[#allocation10 + $0x58] sm:$0xff] }
  0x31   :  { %v124_v44 = vperm.slane %v122_v41, 0  ;;  %v125_v45 = vperm.slane %v122_v41, 1  ;;  %v865_v54 = vld [vmem:[#allocation10 + $0x10] sm:$0xff]  ;;  %v864_v57 = vld [vmem:[#allocation10 + $0x8] sm:$0xff]  ;;  %v863_v3 = vld [vmem:[#allocation10] sm:$0xff] }
  0x32   :  { %214 = vmatpush.bf16.msra.mxu0 %v646_v7  ;;  %343 = vmatpush.bf16.msra.mxu2 %v718_v17  ;;  %v873_v55 = vld [vmem:[#allocation10 + $0x50] sm:$0xff]  ;;  %v872_v58 = vld [vmem:[#allocation10 + $0x48] sm:$0xff]  ;;  %v871_v4 = vld [vmem:[#allocation10 + $0x40] sm:$0xff] }
  0x33   :  { %228 = vmatpush.bf16.msra.mxu1 %v650_v11  ;;  %357 = vmatpush.bf16.msra.mxu3 %v722_v18  ;;  %v1150_v18 = vld [vmem:[#allocation8] sm:$0x3] }
  0x34   :  { %v254_v25 = vperm.slane %v1150_v18, 0  ;;  %v255_v30 = vperm.slane %v1150_v18, 1 }
  0x36   :  { %215 = vmatpush.bf16.msra.mxu0 %v638_v19  ;;  %344 = vmatpush.bf16.msra.mxu2 %v710_v27 }
  0x37   :  { %229 = vmatpush.bf16.msra.mxu1 %v642_v23  ;;  %358 = vmatpush.bf16.msra.mxu3 %v714_v28 }
  0x39   :  { %216 = vmatmul.bf16.vlgmr.msra.gmra.mxu0 %v105_v26 }
  0x3a   :  { %230 = vmatmul.bf16.vlgmr.msra.gmra.mxu1 %v105_v26  ;;  %345 = vmatpush.bf16.msra.mxu2 %v702_v33 }
  0x3b   :  { %359 = vmatpush.bf16.msra.mxu3 %v706_v34  ;;  %584 = vmatpush.bf16.msrb.mxu0 %v870_v35 }
  0x3c   :  { %598 = vmatpush.bf16.msrb.mxu1 %v878_v36 }
  0x3d   :  { %346 = vmatmul.bf16.vlgmr.msra.gmra.mxu2 %v105_v26 }
  0x3e   :  { %360 = vmatmul.bf16.vlgmr.msra.gmra.mxu3 %v105_v26 }
  0x3f   :  { %585 = vmatpush.bf16.msrb.mxu0 %v869_v37 }
  0x40   :  { %599 = vmatpush.bf16.msrb.mxu1 %v877_v38 }
  0x43   :  { %586 = vmatpush.bf16.msrb.mxu0 %v868_v39 }
  0x44   :  { %600 = vmatpush.bf16.msrb.mxu1 %v876_v40 }
  0x47   :  { %587 = vmatpush.bf16.msrb.mxu0 %v867_v42 }
  0x48   :  { %601 = vmatpush.bf16.msrb.mxu1 %v875_v43 }
  0x4b   :  { %588 = vmatpush.bf16.msrb.mxu0 %v866_v47 }
  0x4c   :  { %602 = vmatpush.bf16.msrb.mxu1 %v874_v48 }
  0x4f   :  { %589 = vmatpush.bf16.msrb.mxu0 %v865_v54 }
  0x50   :  { %603 = vmatpush.bf16.msrb.mxu1 %v873_v55 }
  0x53   :  { %590 = vmatpush.bf16.msrb.mxu0 %v864_v57 }
  0x54   :  { %604 = vmatpush.bf16.msrb.mxu1 %v872_v58 }
  0x57   :  { %591 = vmatpush.bf16.msrb.mxu0 %v863_v3 }
  0x58   :  { %605 = vmatpush.bf16.msrb.mxu1 %v871_v4 }
  0xb6   :  { %v217_v46 = vpop.f32.mrf.mxu0 }
  0xb7   :  { %v1135_v49 = vadd.f32 %v217_v46, %v124_v44  ;;  %v231_v50 = vpop.f32.mrf.mxu1 }
  0xb8   :  { %v1137_v51 = vadd.f32 %v231_v50, %v125_v45 }
  0xb9   :  { %v763_v52 = vmul.f32 -1.442695, %v1135_v49 }
  0xba   :  { %v764_v53 = vmul.f32 -1.442695, %v1137_v51 }
  0xbb   :  { %890 = vpow2.f32 %v763_v52 }
  0xbc   :  { %892 = vpow2.f32 %v764_v53 }
  0xbe   :  { %v219_v56 = vpop.f32.mrf.mxu0 }
  0xbf   :  { %v1141_v59 = vadd.f32 %v219_v56, %v124_v44  ;;  %v233_v60 = vpop.f32.mrf.mxu1 }
  0xc0   :  { %v1143_v61 = vadd.f32 %v233_v60, %v125_v45  ;;  %v347_v19 = vpop.f32.mrf.mxu2 }
  0xc1   :  { %v891_v62 = vpop.eup %890  ;;  %v765_v63 = vmul.f32 -1.442695, %v1141_v59  ;;  %v361_v26 = vpop.f32.mrf.mxu3  ;;  %v348_v41 = vadd.f32 %v347_v19, %v254_v25 }
  0xc2   :  { %v893_v0 = vpop.eup %892  ;;  %v378_v1 = vadd.f32 1.0, %v891_v62  ;;  %v766_v2 = vmul.f32 -1.442695, %v1143_v61  ;;  %v362_v3 = vadd.f32 %v361_v26, %v255_v30 }
  0xc3   :  { %v379_v5 = vadd.f32 1.0, %v893_v0  ;;  %894 = vpow2.f32 %v765_v63 }
  0xc4   :  { %896 = vrcp.f32 %v378_v1  ;;  %v391_v22 = vand.u32 2147483647, %v378_v1  ;;  %v393_v23 = vand.u32 2147483648, %v378_v1  ;;  %vm387_vm1 = vweird.f32 %v378_v1 }
  0xc5   :  { %898 = vrcp.f32 %v379_v5  ;;  %v406_v29 = vand.u32 2147483647, %v379_v5  ;;  %vm402_vm4 = vweird.f32 %v379_v5  ;;  %v408_v33 = vand.u32 2147483648, %v379_v5 }
  0xc6   :  { %900 = vpow2.f32 %v766_v2  ;;  %vm392_vm5 = vcmp.eq.f32.partialorder %v391_v22, 8.507059e+37  ;;  %v394_v35 = vor.u32 1.1754944e-38, %v393_v23 }
  0xc7   :  { %vm407_vm8 = vcmp.eq.f32.partialorder %v406_v29, 8.507059e+37  ;;  %v409_v45 = vor.u32 1.1754944e-38, %v408_v33 }
  0xc8   :  { %v349_v53 = vpop.f32.mrf.mxu2 }
  0xc9   :  { %v895_v6 = vpop.eup %894  ;;  %v350_v63 = vadd.f32 %v349_v53, %v254_v25  ;;  %v363_v0 = vpop.f32.mrf.mxu3 }
  0xca   :  { %v897_v7 = vpop.eup %896  ;;  %v380_v8 = vadd.f32 1.0, %v895_v6 }
  0xcb   :  { %v899_v9 = vpop.eup %898  ;;  %v383_v10 = vmul.f32 %v897_v7, %v378_v1  ;;  %vm388_vm0 = vweird.f32 %v897_v7 }
  0xcc   :  { %v901_v11 = vpop.eup %900  ;;  %v398_v12 = vmul.f32 %v899_v9, %v379_v5  ;;  %902 = vrcp.f32 %v380_v8  ;;  %vm1153_vm2 = vmor %vm387_vm1, %vm388_vm0  ;;  %vm403_vm3 = vweird.f32 %v899_v9  ;;  %v423_v36 = vand.u32 2147483648, %v380_v8 }
  0xcd   :  { %v384_v13 = vsub.f32 1.0, %v383_v10  ;;  %v1147_v14 = vadd.f32 1.0, %v901_v11  ;;  %vm1161_vm6 = vmor %vm402_vm4, %vm403_vm3  ;;  %v421_v40 = vand.u32 2147483647, %v380_v8  ;;  %vm417_vm9 = vweird.f32 %v380_v8  ;;  %v889_v11 = vld [vmem:[%s1189_s6] ss:$0 sm:$0xff] }
  0xce   :  { %v399_v15 = vsub.f32 1.0, %v398_v12  ;;  %v424_v48 = vor.u32 1.1754944e-38, %v423_v36 }
  0xcf   :  { %v385_v16 = vmul.f32 %v897_v7, %v384_v13  ;;  %904 = vrcp.f32 %v1147_v14  ;;  %v438_v47 = vand.u32 2147483648, %v1147_v14  ;;  %v436_v52 = vand.u32 2147483647, %v1147_v14 }
  0xd0   :  { %v400_v17 = vmul.f32 %v899_v9, %v399_v15  ;;  %vm422_vm12 = vcmp.eq.f32.partialorder %v421_v40, 8.507059e+37  ;;  %vm432_vm13 = vweird.f32 %v1147_v14 }
  0xd1   :  { %v386_v20 = vadd.f32 %v897_v7, %v385_v16  ;;  %v439_v62 = vor.u32 1.1754944e-38, %v438_v47  ;;  %vm437_vm15 = vcmp.eq.f32.partialorder %v436_v52, 8.507059e+37 }
  0xd2   :  { %v903_v21 = vpop.eup %902  ;;  %v401_v28 = vadd.f32 %v899_v9, %v400_v17 }
  0xd3   :  { %v413_v24 = vmul.f32 %v903_v21, %v380_v8  ;;  %v390_v32 = vsel %vm1153_vm2, %v897_v7, %v386_v20  ;;  %vm418_vm7 = vweird.f32 %v903_v21  ;;  %v364_v7 = vadd.f32 %v363_v0, %v255_v30 }
  0xd4   :  { %v395_v42 = vsel %vm392_vm5, %v394_v35, %v390_v32  ;;  %v405_v43 = vsel %vm1161_vm6, %v899_v9, %v401_v28  ;;  %vm419_vm10 = vmor %vm417_vm9, %vm418_vm7 }
  0xd5   :  { %v905_v31 = vpop.eup %904  ;;  %v414_v34 = vsub.f32 1.0, %v413_v24  ;;  %v442_v54 = vmul.f32 %v395_v42, %v1135_v49  ;;  %v410_v55 = vsel %vm407_vm8, %v409_v45, %v405_v43 }
  0xd6   :  { %v428_v37 = vmul.f32 %v905_v31, %v1147_v14  ;;  %vm433_vm11 = vweird.f32 %v905_v31  ;;  %v443_v1 = vmul.f32 %v410_v55, %v1137_v51 }
  0xd7   :  { %v415_v39 = vmul.f32 %v903_v21, %v414_v34  ;;  %vm434_vm14 = vmor %vm432_vm13, %vm433_vm11  ;;  %v446_v49 = vmul.f32 %v442_v54, %v348_v41 }
  0xd8   :  { %v429_v44 = vsub.f32 1.0, %v428_v37  ;;  %v447_v9 = vmul.f32 %v443_v1, %v362_v3 }
  0xd9   :  { %v416_v46 = vadd.f32 %v903_v21, %v415_v39 }
  0xda   :  { %v430_v50 = vmul.f32 %v905_v31, %v429_v44 }
  0xdb   :  { %v420_v56 = vsel %vm419_vm10, %v903_v21, %v416_v46 }
  0xdc   :  { %v425_v57 = vsel %vm422_vm12, %v424_v48, %v420_v56  ;;  %v431_v58 = vadd.f32 %v905_v31, %v430_v50 }
  0xdd   :  { %v444_v60 = vmul.f32 %v425_v57, %v1141_v59 }
  0xde   :  { %v435_v2 = vsel %vm434_vm14, %v905_v31, %v431_v58 }
  0xdf   :  { %v440_v4 = vsel %vm437_vm15, %v439_v62, %v435_v2  ;;  %v448_v5 = vmul.f32 %v444_v60, %v350_v63 }
  0xe0   :  { %v445_v6 = vmul.f32 %v440_v4, %v1143_v61 }
  0xe1   :  { %v450_v8 = vpack.c.bf16 %v448_v5, %v446_v49 }
  0xe2   :  { %v449_v10 = vmul.f32 %v445_v6, %v364_v7 }
  0xe3   :  { %592 = vmatmul.bf16.vlgmr.msrb.gmra.mxu0 %v450_v8 }
  0xe4   :  { %v451_v59 = vpack.c.bf16 %v449_v10, %v447_v9 }
  0xe6   :  { %606 = vmatmul.bf16.vlgmr.msrb.gmra.mxu1 %v451_v59 }
 0x160   :  { %v593_v51 = vpop.f32.mrf.mxu0 }
 0x161   :  { %v594_v12 = vadd.f32 %v889_v11, %v593_v51 }
 0x163   :  { %v607_v13 = vpop.f32.mrf.mxu1 }
 0x164   :  { %v608_v14 = vadd.f32 %v607_v13, %v594_v12 }
 0x166   :  { %612 = vst [vmem:[#allocation11] sm:$0xff] %v608_v14 }
 0x168   :  { %v595_v15 = vpop.f32.mrf.mxu0 }
 0x169   :  { %v596_v16 = vadd.f32 %v889_v11, %v595_v15 }
 0x16b   :  { %v609_v61 = vpop.f32.mrf.mxu1 }
 0x16c   :  { %v610_v17 = vadd.f32 %v609_v61, %v596_v16 }
 0x16e   :  { %613 = vst [vmem:[#allocation11 + $0x8] sm:$0xff] %v610_v17 }
 0x16f   :  { %626 = dma.vmem_to_hbm [thread:$0]  %s619_s29, 256, %s621_s11, [#allocation4], %s1059_s9, %s1059_s9, %s1060_s10  }
 0x170   :  { %1056 = dma.done.wait [#allocation4], 256  }
 0x171   :  { %1057 = vsyncadd [#allocation4], 4294967040 }
 0x172   :  { %631 = vsyncpa [#allocation3], 1 }
 0x173   :  { %632 = vsyncpa [#allocation6], 1 }
 0x174   :  { %633 = vsyncpa [#allocation9], 1 }
 0x175   :  { %634 = vsyncpa [#allocation4], 1 }

</bundles_post_ra>
